<compile_context>
chip_gen: v7x
topology: tpu7x:2x2x1
jax: 0.10.0
libtpu: 0.0.40
codegen_flags: <defaults>
</compile_context>

<pallas_src>
import math

import jax
import jax.numpy as jnp
from jax.experimental import pallas as pl
from jax.experimental.pallas import tpu as pltpu


_VMEM_LIMIT = 32 * 1024 * 1024


def _round_up(x, m):
    return ((x + m - 1) // m) * m


# ---------------------------------------------------------------------------
# Tiling heuristics
# ---------------------------------------------------------------------------

def _node_tiling(n):
    """(tm, tk, n_pad) for the node dimension (M rows of adj/out, K cols of adj).

    Stage 2 is HBM-bound on the adj stream, so we want the biggest adj tiles
    we can get without blowing up padded adj traffic (which scales with
    n_pad**2) and while keeping >= 2 tiles on the parallel M axis so both v7x
    TensorCores get work."""
    p128 = _round_up(n, 128)
    if p128 <= 1024:
        # Whole node dim is a single K tile (adj streamed in full rows, no K
        # loop); split M in two when possible for v7x 2-TC occupancy.
        tm = p128 // 2 if p128 >= 256 else p128
        return tm, p128, p128
    # Large graphs: square tiles; trade padded-adj bytes against the measured
    # HBM roofline fraction of the per-step DMA size (bigger tiles stream adj
    # at a higher fraction of HBM bandwidth).
    best = None
    for tile, eff in ((512, 0.85), (384, 0.78), (256, 0.63), (128, 0.35)):
        n_pad = _round_up(n, tile)
        cost = (n_pad * n_pad) / eff        # ~ adj HBM time
        if best is None or cost < best[0]:
            best = (cost, tile, n_pad)
    _, tile, n_pad = best
    return tile, tile, n_pad


def _fin_tiling(fin):
    p = _round_up(fin, 128)
    if p <= 1024:
        return p, p
    return 512, _round_up(fin, 512)


def _fout_tiling(fout):
    p = _round_up(fout, 128)
    if p <= 1024:
        return p, p          # single j tile: adj is streamed exactly once
    # Wide outputs: j is tiled and the adj index_map ignores j, so adj gets
    # re-read once per j tile -- accepted consciously (rare for GCNs).
    return 512, _round_up(fout, 512)


# ---------------------------------------------------------------------------
# Stage 1: support = x @ W   (bf16 output, f32 scratch accumulator)
# ---------------------------------------------------------------------------

def _xw_kernel(a_ref, b_ref, o_ref, acc_ref):
    @pl.when(pl.program_id(2) == 0)
    def _():
        acc_ref[...] = jnp.zeros_like(acc_ref)

    acc_ref[...] += jnp.dot(a_ref[...], b_ref[...],
                            preferred_element_type=jnp.float32)

    @pl.when(pl.program_id(2) == pl.num_programs(2) - 1)
    def _():
        o_ref[...] = acc_ref[...].astype(o_ref.dtype)


def _xw_matmul(a, b, *, tm, tn, tk, out_dtype=jnp.bfloat16):
    m, k = a.shape
    _, n = b.shape
    grid = (m // tm, n // tn, k // tk)
    return pl.pallas_call(
        _xw_kernel,
        out_shape=jax.ShapeDtypeStruct((m, n), out_dtype),
        grid_spec=pltpu.PrefetchScalarGridSpec(
            num_scalar_prefetch=0,
            grid=grid,
            in_specs=[pl.BlockSpec((tm, tk), lambda i, j, kk: (i, kk)),
                      pl.BlockSpec((tk, tn), lambda i, j, kk: (kk, j))],
            out_specs=pl.BlockSpec((tm, tn), lambda i, j, kk: (i, j)),
            scratch_shapes=[pltpu.VMEM((tm, tn), jnp.float32)],
        ),
        compiler_params=pltpu.CompilerParams(
            dimension_semantics=("parallel", "parallel", "arbitrary"),
            vmem_limit_bytes=_VMEM_LIMIT,
        ),
        cost_estimate=pl.CostEstimate(
            flops=2 * m * n * k, transcendentals=0,
            bytes_accessed=(a.size * a.dtype.itemsize
                            + b.size * b.dtype.itemsize
                            + m * n * jnp.dtype(out_dtype).itemsize)),
    )(a, b)


# ---------------------------------------------------------------------------
# Stage 2: out = adj @ support (+ bias)
#
# One kernel serves both the dense and block-sparse adjacency paths:
#   * scalar-prefetched (counts, block-index) tables in SMEM drive the adj /
#     support index_maps,
#   * steps past a row tile's count repeat the previous block index (Pallas
#     skips the identical-index DMA) and the MXU work is gated with pl.when,
#   * the f32 output block is VMEM-resident across the s axis, so we
#     accumulate directly into o_ref (no scratch, no extra full-tile copy),
#   * adj tiles are cast to bf16 on the VPU inside the kernel, so an aligned
#     f32 adj can be fed straight from HBM without any wrapper pre-pass.
# ---------------------------------------------------------------------------

def _adj_kernel(cnt_ref, idx_ref, adj_ref, sup_ref, o_ref):
    i, s = pl.program_id(0), pl.program_id(2)

    @pl.when(s == 0)
    def _():
        o_ref[...] = jnp.zeros_like(o_ref)

    @pl.when(s < cnt_ref[i])
    def _():
        o_ref[...] += jnp.dot(adj_ref[...].astype(jnp.bfloat16),
                              sup_ref[...].astype(jnp.bfloat16),
                              preferred_element_type=jnp.float32)


def _adj_bias_kernel(cnt_ref, idx_ref, adj_ref, sup_ref, bias_ref, o_ref):
    i, s = pl.program_id(0), pl.program_id(2)

    @pl.when(s == 0)
    def _():
        o_ref[...] = jnp.zeros_like(o_ref)

    @pl.when(s < cnt_ref[i])
    def _():
        o_ref[...] += jnp.dot(adj_ref[...].astype(jnp.bfloat16),
                              sup_ref[...].astype(jnp.bfloat16),
                              preferred_element_type=jnp.float32)

    @pl.when(s == pl.num_programs(2) - 1)
    def _():
        o_ref[...] += bias_ref[...].astype(jnp.float32)


def _adj_matmul(counts, blk_idx, adj, support, bias, *, tm, tn, tk):
    m, k = adj.shape
    _, n = support.shape
    grid = (m // tm, n // tn, k // tk)

    in_specs = [
        # NOTE(v7x): if profiling shows exposed adj DMA at 3.2 TB/s HBM, add
        # pipeline_mode=pl.Buffered(3) here (costs one extra adj tile of VMEM).
        pl.BlockSpec((tm, tk), lambda i, j, s, cnt, idx: (i, idx[i, s])),
        pl.BlockSpec((tk, tn), lambda i, j, s, cnt, idx: (idx[i, s], j)),
    ]
    args = [counts, blk_idx, adj, support]
    kernel = _adj_kernel
    bytes_accessed = (adj.size * adj.dtype.itemsize
                      + support.size * support.dtype.itemsize + m * n * 4)
    if bias is not None:
        in_specs.append(pl.BlockSpec((1, tn), lambda i, j, s, cnt, idx: (0, j)))
        args.append(bias)
        kernel = _adj_bias_kernel
        bytes_accessed += bias.size * bias.dtype.itemsize

    return pl.pallas_call(
        kernel,
        out_shape=jax.ShapeDtypeStruct((m, n), jnp.float32),
        grid_spec=pltpu.PrefetchScalarGridSpec(
            num_scalar_prefetch=2,
            grid=grid,
            in_specs=in_specs,
            out_specs=pl.BlockSpec((tm, tn), lambda i, j, s, cnt, idx: (i, j)),
        ),
        compiler_params=pltpu.CompilerParams(
            dimension_semantics=("parallel", "parallel", "arbitrary"),
            vmem_limit_bytes=_VMEM_LIMIT,
        ),
        cost_estimate=pl.CostEstimate(
            flops=2 * m * n * k, transcendentals=0,
            bytes_accessed=bytes_accessed),
    )(*args)


# ---------------------------------------------------------------------------
# Adjacency block structure (scalar-prefetch tables)
# ---------------------------------------------------------------------------

def _dense_block_structure(n_row_tiles, n_col_tiles):
    counts = jnp.full((n_row_tiles,), n_col_tiles, dtype=jnp.int32)
    idx = jnp.broadcast_to(jnp.arange(n_col_tiles, dtype=jnp.int32)[None, :],
                           (n_row_tiles, n_col_tiles))
    return counts, idx


def _sparse_block_structure(adj_p, tm, tk):
    """Per adj row tile: number of nonzero column blocks and their block
    indices packed to the front (tail padded by repeating the last valid
    index so Pallas skips the re-DMA of an identical block)."""
    n_row_tiles = adj_p.shape[0] // tm
    n_col_tiles = adj_p.shape[1] // tk
    blk_nz = jnp.any(
        adj_p.reshape(n_row_tiles, tm, n_col_tiles, tk) != 0, axis=(1, 3))
    counts = jnp.sum(blk_nz, axis=1).astype(jnp.int32)
    order = jnp.argsort(jnp.logical_not(blk_nz), axis=1,
                        stable=True).astype(jnp.int32)
    pos = jnp.arange(n_col_tiles, dtype=jnp.int32)[None, :]
    last = jnp.take_along_axis(order,
                               jnp.maximum(counts - 1, 0)[:, None], axis=1)
    idx = jnp.where(pos < counts[:, None], order, last)
    return counts, idx


# ---------------------------------------------------------------------------
# GCN layer wrapper
# ---------------------------------------------------------------------------

def _graph_convolution_impl(x, adj, weight, bias=None, *,
                            block_sparse=False, node_tiles=None):
    """Pallas GCN forward: adj @ (dropout(x) @ weight) [+ bias].

    block_sparse=True additionally extracts the nonzero block structure of adj
    (one jit-fused pass) and skips DMA + MXU work for all-zero adj tiles --
    worthwhile when the adjacency has block-level sparsity (clustered / banded
    graphs) or when the structure is reused across layers / steps."""
    # TODO(synk): training-mode nn.Dropout (random masking + 1/(1-p) scaling)
    #             is not reproduced; eval-mode dropout == identity.
    n, fin = x.shape
    fin_w, fout = weight.shape
    assert fin == fin_w
    assert adj.shape == (n, n)

    if node_tiles is None:
        tm, tk, n_pad = _node_tiling(n)
    else:                                   # testing hook
        tm, tk = node_tiles
        n_pad = _round_up(n, math.lcm(tm, tk))
    tk1, fin_pad = _fin_tiling(fin)
    tn, fout_pad = _fout_tiling(fout)

    # ---- stage 1: support = x @ W  (x / W are small: pad + cast to bf16) ----
    x_p = jnp.pad(x.astype(jnp.bfloat16),
                  ((0, n_pad - n), (0, fin_pad - fin)))
    w_p = jnp.pad(weight.astype(jnp.bfloat16),
                  ((0, fin_pad - fin), (0, fout_pad - fout)))
    support = _xw_matmul(x_p, w_p, tm=tm, tn=tn, tk=tk1)

    # ---- stage 2: out = adj @ support (+ bias) ----
    if n_pad == n:
        # No wrapper-side pre-pass over adj: the kernel reads f32 adj straight
        # from HBM and casts each tile to bf16 on the VPU.
        adj_p = adj
    else:
        # Padding required: cast to bf16 in the same (jit-fused) pass so the
        # kernel re-reads 2 B/elem instead of 4.
        adj_p = jnp.pad(adj.astype(jnp.bfloat16),
                        ((0, n_pad - n), (0, n_pad - n)))

    if block_sparse:
        counts, idx = _sparse_block_structure(adj_p, tm, tk)
    else:
        counts, idx = _dense_block_structure(n_pad // tm, n_pad // tk)

    bias_p = None
    if bias is not None:
        bias_p = jnp.pad(bias.astype(jnp.float32).reshape(1, fout),
                         ((0, 0), (0, fout_pad - fout)))

    out_p = _adj_matmul(counts, idx, adj_p, support, bias_p,
                        tm=tm, tn=tn, tk=tk)
    return out_p[:n, :fout]


# jit the wrapper so the pad / cast of x, W, adj, the block-structure
# extraction and the final slice fuse with neighbouring ops instead of
# materializing as separate HBM passes + dispatches.
graph_convolution = jax.jit(_graph_convolution_impl,
                            static_argnames=("block_sparse", "node_tiles"))


# ---------------------------------------------------------------------------
# Self-test
# ---------------------------------------------------------------------------

def xavier_uniform(key, fan_in, fan_out):
    bound = math.sqrt(6.0 / (fan_in + fan_out))
    return jax.random.uniform(key, (fan_in, fan_out), dtype=jnp.float32,
                              minval=-bound, maxval=bound)


def _normalize_adj(a):
    deg = jnp.sum(a, axis=1)
    d = 1.0 / jnp.sqrt(jnp.maximum(deg, 1.0))
    return a * d[:, None] * d[None, :]


def make_random_adj(key, n, density=0.1):
    a = (jax.random.uniform(key, (n, n)) < density).astype(jnp.float32)
    a = jnp.maximum(a, a.T) + jnp.eye(n, dtype=jnp.float32)
    return _normalize_adj(a)


def make_block_banded_adj(key, n, block, density=0.3):
    """Adjacency whose nonzeros live only within +-1 block of the diagonal
    (block-level sparsity that the block_sparse path can exploit)."""
    a = (jax.random.uniform(key, (n, n)) < density).astype(jnp.float32)
    bi = jnp.arange(n) // block
    band = (jnp.abs(bi[:, None] - bi[None, :]) <= 1).astype(jnp.float32)
    a = a * band
    a = jnp.maximum(a, a.T) + jnp.eye(n, dtype=jnp.float32)
    return _normalize_adj(a)


def bf16_ref(x, adj, w, b=None):
    f = lambda t: t.astype(jnp.bfloat16).astype(jnp.float32)
    s = (f(x) @ f(w)).astype(jnp.bfloat16).astype(jnp.float32)
    out = f(adj) @ s
    if b is not None:
        out = out + b.astype(jnp.float32)
    return out


if __name__ == "__main__":
    key = jax.random.PRNGKey(0)
    keys = jax.random.split(key, 10)

    # Case 1: module defaults (bias=False), tile-aligned N -> no adj pre-pass
    # (f32 adj fed straight to the kernel), 2 parallel M tiles, single K tile.
    N1, FIN1, FOUT1 = 256, 32, 16
    x1 = jax.random.normal(keys[0], (N1, FIN1), dtype=jnp.float32)
    adj1 = make_random_adj(keys[1], N1)
    w1 = xavier_uniform(keys[2], FIN1, FOUT1)
    out1 = jax.block_until_ready(graph_convolution(x1, adj1, w1, None))
    assert out1.shape == (N1, FOUT1)
    assert jnp.allclose(out1, bf16_ref(x1, adj1, w1), atol=2e-2, rtol=2e-2), \
        "mismatch vs reference (case 1, no bias)"

    # Case 2: bias=True, non-aligned dims -> exercises the fused pad + bf16
    # cast of adj and the fused-bias epilogue.
    N2, FIN2, FOUT2 = 300, 40, 24
    x2 = jax.random.normal(keys[3], (N2, FIN2), dtype=jnp.float32)
    adj2 = make_random_adj(keys[4], N2)
    w2 = xavier_uniform(keys[5], FIN2, FOUT2)
    b2 = 0.1 * jax.random.normal(keys[6], (FOUT2,), dtype=jnp.float32)
    out2 = jax.block_until_ready(graph_convolution(x2, adj2, w2, b2))
    assert out2.shape == (N2, FOUT2)
    assert jnp.allclose(out2, bf16_ref(x2, adj2, w2, b2), atol=2e-2, rtol=2e-2), \
        "mismatch vs reference (case 2, bias)"

    # Case 3: block-banded adjacency with an all-zero row tile; run the
    # block-sparse path against the dense path on the same inputs (small
    # 128x128 node tiles forced so the K axis has several blocks and the
    # packing / gating / DMA-skip logic is genuinely exercised).
    N3, FIN3, FOUT3, BLK = 512, 64, 32, 128
    x3 = jax.random.normal(keys[7], (N3, FIN3), dtype=jnp.float32)
    adj3 = make_block_banded_adj(keys[8], N3, BLK)
    adj3 = adj3.at[2 * BLK:3 * BLK, :].set(0.0)     # an all-zero row tile
    adj3 = adj3.at[:, 2 * BLK:3 * BLK].set(0.0)
    w3 = xavier_uniform(keys[9], FIN3, FOUT3)
    out3_dense = graph_convolution(x3, adj3, w3, None,
                                   node_tiles=(BLK, BLK))
    out3_sparse = graph_convolution(x3, adj3, w3, None,
                                    block_sparse=True, node_tiles=(BLK, BLK))
    out3_dense, out3_sparse = jax.block_until_ready((out3_dense, out3_sparse))
    assert jnp.allclose(out3_sparse, out3_dense, atol=1e-5, rtol=1e-5), \
        "block-sparse path disagrees with dense path"
    assert jnp.allclose(out3_sparse, bf16_ref(x3, adj3, w3),
                        atol=2e-2, rtol=2e-2), \
        "mismatch vs reference (case 3, block-sparse)"

    print("KERNEL_OK")
</pallas_src>

<mosaic_0001>
module attributes {stable_mosaic.version = 11 : i64} {
  func.func @_xw_kernel(%arg0: i32, %arg1: i32, %arg2: i32, %arg3: memref<128x128xbf16, #tpu.memory_space<vmem>>, %arg4: memref<128x128xbf16, #tpu.memory_space<vmem>>, %arg5: memref<128x128xbf16, #tpu.memory_space<vmem>>, %arg6: memref<128x128xf32, #tpu.memory_space<vmem>>) attributes {dimension_semantics = [#tpu.dimension_semantics<parallel>, #tpu.dimension_semantics<parallel>, #tpu.dimension_semantics<arbitrary>], iteration_bounds = array<i64: 2, 1, 1>, scalar_prefetch = 0 : i64, scratch_operands = 1 : i64, tpu.core_type = #tpu.core_type<tc>, window_params = [{transform_indices = @transform_0, window_bounds = array<i64: 128, 128>}, {transform_indices = @transform_1, window_bounds = array<i64: 128, 128>}, {transform_indices = @transform_2, window_bounds = array<i64: 128, 128>}]} {
    %c0_i32 = arith.constant 0 : i32
    %0 = arith.cmpi eq, %arg2, %c0_i32 : i32
    %1 = arith.extui %0 : i1 to i32
    %c0_i32_0 = arith.constant 0 : i32
    %2 = arith.cmpi ne, %1, %c0_i32_0 : i32
    scf.if %2 {
      %cst_10 = arith.constant 0.000000e+00 : f32
      %12 = vector.broadcast %cst_10 : f32 to vector<128x128xf32>
      %c0_11 = arith.constant 0 : index
      %c0_12 = arith.constant 0 : index
      %13 = vector.load %arg6[%c0_11, %c0_12] : memref<128x128xf32, #tpu.memory_space<vmem>>, vector<128x128xf32>
      tpu.vector_store %arg6[%c0_11, %c0_12], %12 {strides = array<i32>} : memref<128x128xf32, #tpu.memory_space<vmem>>, vector<128x128xf32>,
    } else {
    }
    %c0 = arith.constant 0 : index
    %c0_1 = arith.constant 0 : index
    %3 = vector.load %arg6[%c0, %c0_1] : memref<128x128xf32, #tpu.memory_space<vmem>>, vector<128x128xf32>
    %c0_2 = arith.constant 0 : index
    %c0_3 = arith.constant 0 : index
    %4 = vector.load %arg3[%c0_2, %c0_3] : memref<128x128xbf16, #tpu.memory_space<vmem>>, vector<128x128xbf16>
    %c0_4 = arith.constant 0 : index
    %c0_5 = arith.constant 0 : index
    %5 = vector.load %arg4[%c0_4, %c0_5] : memref<128x128xbf16, #tpu.memory_space<vmem>>, vector<128x128xbf16>
    %cst = arith.constant dense<0.000000e+00> : vector<128x128xf32>
    %6 = tpu.matmul %4, %5, %cst {dimension_numbers = #tpu.dot_dimension_numbers<[1], [0], [0], [1], [0, 0, 1, 1], [], []>} : vector<128x128xbf16>, vector<128x128xbf16>, vector<128x128xf32> -> vector<128x128xf32>
    %7 = arith.addf %3, %6 : vector<128x128xf32>
    %c0_6 = arith.constant 0 : index
    %c0_7 = arith.constant 0 : index
    %8 = vector.load %arg6[%c0_6, %c0_7] : memref<128x128xf32, #tpu.memory_space<vmem>>, vector<128x128xf32>
    tpu.vector_store %arg6[%c0_6, %c0_7], %7 {strides = array<i32>} : memref<128x128xf32, #tpu.memory_space<vmem>>, vector<128x128xf32>,
    %c0_i32_8 = arith.constant 0 : i32
    %9 = arith.cmpi eq, %arg2, %c0_i32_8 : i32
    %10 = arith.extui %9 : i1 to i32
    %c0_i32_9 = arith.constant 0 : i32
    %11 = arith.cmpi ne, %10, %c0_i32_9 : i32
    scf.if %11 {
      %c0_10 = arith.constant 0 : index
      %c0_11 = arith.constant 0 : index
      %12 = vector.load %arg6[%c0_10, %c0_11] : memref<128x128xf32, #tpu.memory_space<vmem>>, vector<128x128xf32>
      %13 = arith.truncf %12 : vector<128x128xf32> to vector<128x128xbf16>
      %c0_12 = arith.constant 0 : index
      %c0_13 = arith.constant 0 : index
      %14 = vector.load %arg5[%c0_12, %c0_13] : memref<128x128xbf16, #tpu.memory_space<vmem>>, vector<128x128xbf16>
      tpu.vector_store %arg5[%c0_12, %c0_13], %13 {strides = array<i32>} : memref<128x128xbf16, #tpu.memory_space<vmem>>, vector<128x128xbf16>,
    } else {
    }
    return
  }
  func.func @transform_0(%arg0: i32, %arg1: i32, %arg2: i32) -> (i32, i32) {
    %c0_i32 = arith.constant 0 : i32
    return %arg0, %arg2 : i32, i32
  }
  func.func @transform_1(%arg0: i32, %arg1: i32, %arg2: i32) -> (i32, i32) {
    %c0_i32 = arith.constant 0 : i32
    return %arg2, %arg1 : i32, i32
  }
  func.func @transform_2(%arg0: i32, %arg1: i32, %arg2: i32) -> (i32, i32) {
    %c0_i32 = arith.constant 0 : i32
    return %arg0, %arg1 : i32, i32
  }
}

module attributes {stable_mosaic.version = 11 : i64} {
  func.func @_adj_kernel(%arg0: i32, %arg1: i32, %arg2: i32, %arg3: memref<2xi32, #tpu.memory_space<smem>>, %arg4: memref<2x1xi32, #tpu.memory_space<smem>>, %arg5: memref<128x256xf32, #tpu.memory_space<vmem>>, %arg6: memref<256x128xbf16, #tpu.memory_space<vmem>>, %arg7: memref<128x128xf32, #tpu.memory_space<vmem>>) attributes {dimension_semantics = [#tpu.dimension_semantics<parallel>, #tpu.dimension_semantics<parallel>, #tpu.dimension_semantics<arbitrary>], iteration_bounds = array<i64: 2, 1, 1>, scalar_prefetch = 2 : i64, scratch_operands = 0 : i64, tpu.core_type = #tpu.core_type<tc>, window_params = [{transform_indices = @transform_0, window_bounds = array<i64: 128, 256>}, {transform_indices = @transform_1, window_bounds = array<i64: 256, 128>}, {transform_indices = @transform_2, window_bounds = array<i64: 128, 128>}]} {
    %c0_i32 = arith.constant 0 : i32
    %0 = arith.cmpi eq, %arg2, %c0_i32 : i32
    %1 = arith.extui %0 : i1 to i32
    %c0_i32_0 = arith.constant 0 : i32
    %2 = arith.cmpi ne, %1, %c0_i32_0 : i32
    scf.if %2 {
      %cst = arith.constant 0.000000e+00 : f32
      %8 = vector.broadcast %cst : f32 to vector<128x128xf32>
      %c0 = arith.constant 0 : index
      %c0_2 = arith.constant 0 : index
      %9 = vector.load %arg7[%c0, %c0_2] : memref<128x128xf32, #tpu.memory_space<vmem>>, vector<128x128xf32>
      tpu.vector_store %arg7[%c0, %c0_2], %8 {strides = array<i32>} : memref<128x128xf32, #tpu.memory_space<vmem>>, vector<128x128xf32>,
    } else {
    }
    %3 = arith.index_cast %arg0 : i32 to index
    %4 = memref.load %arg3[%3] : memref<2xi32, #tpu.memory_space<smem>>
    %5 = arith.cmpi slt, %arg2, %4 : i32
    %6 = arith.extui %5 : i1 to i32
    %c0_i32_1 = arith.constant 0 : i32
    %7 = arith.cmpi ne, %6, %c0_i32_1 : i32
    scf.if %7 {
      %c0 = arith.constant 0 : index
      %c0_2 = arith.constant 0 : index
      %8 = vector.load %arg7[%c0, %c0_2] : memref<128x128xf32, #tpu.memory_space<vmem>>, vector<128x128xf32>
      %c0_3 = arith.constant 0 : index
      %c0_4 = arith.constant 0 : index
      %9 = vector.load %arg5[%c0_3, %c0_4] : memref<128x256xf32, #tpu.memory_space<vmem>>, vector<128x256xf32>
      %10 = arith.truncf %9 : vector<128x256xf32> to vector<128x256xbf16>
      %c0_5 = arith.constant 0 : index
      %c0_6 = arith.constant 0 : index
      %11 = vector.load %arg6[%c0_5, %c0_6] : memref<256x128xbf16, #tpu.memory_space<vmem>>, vector<256x128xbf16>
      %cst = arith.constant dense<0.000000e+00> : vector<128x128xf32>
      %12 = tpu.matmul %10, %11, %cst {dimension_numbers = #tpu.dot_dimension_numbers<[1], [0], [0], [1], [0, 0, 1, 1], [], []>} : vector<128x256xbf16>, vector<256x128xbf16>, vector<128x128xf32> -> vector<128x128xf32>
      %13 = arith.addf %8, %12 : vector<128x128xf32>
      %c0_7 = arith.constant 0 : index
      %c0_8 = arith.constant 0 : index
      %14 = vector.load %arg7[%c0_7, %c0_8] : memref<128x128xf32, #tpu.memory_space<vmem>>, vector<128x128xf32>
      tpu.vector_store %arg7[%c0_7, %c0_8], %13 {strides = array<i32>} : memref<128x128xf32, #tpu.memory_space<vmem>>, vector<128x128xf32>,
    } else {
    }
    return
  }
  func.func @transform_0(%arg0: i32, %arg1: i32, %arg2: i32, %arg3: memref<2xi32, #tpu.memory_space<smem>>, %arg4: memref<2x1xi32, #tpu.memory_space<smem>>) -> (i32, i32) {
    %0 = arith.index_cast %arg0 : i32 to index
    %1 = arith.index_cast %arg2 : i32 to index
    %2 = memref.load %arg4[%0, %1] : memref<2x1xi32, #tpu.memory_space<smem>>
    %c0_i32 = arith.constant 0 : i32
    return %arg0, %2 : i32, i32
  }
  func.func @transform_1(%arg0: i32, %arg1: i32, %arg2: i32, %arg3: memref<2xi32, #tpu.memory_space<smem>>, %arg4: memref<2x1xi32, #tpu.memory_space<smem>>) -> (i32, i32) {
    %0 = arith.index_cast %arg0 : i32 to index
    %1 = arith.index_cast %arg2 : i32 to index
    %2 = memref.load %arg4[%0, %1] : memref<2x1xi32, #tpu.memory_space<smem>>
    %c0_i32 = arith.constant 0 : i32
    return %2, %arg1 : i32, i32
  }
  func.func @transform_2(%arg0: i32, %arg1: i32, %arg2: i32, %arg3: memref<2xi32, #tpu.memory_space<smem>>, %arg4: memref<2x1xi32, #tpu.memory_space<smem>>) -> (i32, i32) {
    %c0_i32 = arith.constant 0 : i32
    return %arg0, %arg1 : i32, i32
  }
}

</mosaic_0001>

<bundles_post_ra>
// kernel: _graph_convolution_impl.2
= control target key start
LH: loop header
LB: loop body
LE: loop exit
PB: predicated region body
PF: predicated region fallthrough
CT: control target
= control target key end

     0   :  { %s960_s9 = smov 0   ;;  %s962_s10 = smov 0   ;;  %s1034_s0 = inlined_call_operand.vmem [shape: bf16[256,128], index: 0, kind: input, shape index: {}]   ;;  %s1035_s1 = inlined_call_operand.vmem [shape: bf16[128,128], index: 1, kind: input, shape index: {}]   ;;  %s1036_s2 = inlined_call_operand.vmem [shape: bf16[256,128], index: 2, kind: output, shape index: {}]  }
   0x1   :  { %s964_s11 = smov 0  }
   0x2 LB: > { %s31_s12 = sadd.s32 1, %s939_s10  ;;  %p715_p0 = scmp.ge.s32.totalorder %s943_s11, 1  ;;  %s943_s11 = sphi %s964_s11, %s12_s11   ;;  %s939_s10 = sphi %s962_s10, %s1038_s10   ;;  %s935_s9 = sphi %s960_s9, %s1037_s9  }
   0x3   : > { %p33_p1 = scmp.ge.s32.totalorder %s31_s12, 2  ;;  %p155_p2 = scmp.lt.s32.totalorder %s943_s11, 3 }
   0x5   : > { %s1040_s12 = smov (%p33_p1, %s31_s12), 0  ;;  %p156_p3 = pnand %p715_p0, %p155_p2 }
   0x6   : > { %v905_v0 = vld [vmem:[%s1035_s1] sm:$0xff] (!%p156_p3)   ;;  %s716_s15 = sshll.u32 (!%p156_p3), %s935_s9, 4  ;;  %v906_v1 = vld [vmem:[%s1035_s1 + $0x8] sm:$0xff] (!%p156_p3)   ;;  %v907_v2 = vld [vmem:[%s1035_s1 + $0x10] sm:$0xff] (!%p156_p3)  }
   0x7   : > { %159 = sbr.rel (%p156_p3) target bundleno = 265 (0x109), region = 28  ;;  %p192_p4 = scmp.lt.s32.totalorder (!%p156_p3), %s716_s15, 31  ;;  %833 = vmatprep.subr.bf16.mxu0 (!%p156_p3), %v905_v0  ;;  %865 = vmatprep.subr.bf16.mxu1 (!%p156_p3), %v905_v0  ;;  %v908_v3 = vld [vmem:[%s1035_s1 + $0x18] sm:$0xff] (!%p156_p3)   ;;  %v909_v6 = vld [vmem:[%s1035_s1 + $0x20] sm:$0xff] (!%p156_p3)   ;;  %v910_v7 = vld [vmem:[%s1035_s1 + $0x28] sm:$0xff] (!%p156_p3)  }
   0x8   : > { %834 = vmatpush3.bf16.msra.mxu0 (!%p156_p3), %v905_v0  ;;  %873 = vmatpush3.bf16.msra.mxu1 (!%p156_p3), %v905_v0  ;;  %v911_v8 = vld [vmem:[%s1035_s1 + $0x30] sm:$0xff] (!%p156_p3)   ;;  %v912_v9 = vld [vmem:[%s1035_s1 + $0x38] sm:$0xff] (!%p156_p3)  }
   0x9   : > { %835 = vmatprep.subr.bf16.mxu0 (!%p156_p3), %v906_v1  ;;  %866 = vmatprep.subr.bf16.mxu1 (!%p156_p3), %v906_v1 }
   0xc   : > { %836 = vmatpush3.bf16.msra.mxu0 (!%p156_p3), %v906_v1  ;;  %874 = vmatpush3.bf16.msra.mxu1 (!%p156_p3), %v906_v1 }
   0xd   : > { %837 = vmatprep.subr.bf16.mxu0 (!%p156_p3), %v907_v2  ;;  %867 = vmatprep.subr.bf16.mxu1 (!%p156_p3), %v907_v2 }
   0xe   : > { %s1042_s15 = smov (!%p192_p4, %s716_s15), 31 }
   0xf   : > { %s717_s20 = sshll.u32 %s1042_s15, 2 }
  0x10   : > { %s995_s23 = scalar_lea.vmem %s1034_s0, %s717_s20  ;;  %838 = vmatpush3.bf16.msra.mxu0 %v907_v2  ;;  %875 = vmatpush3.bf16.msra.mxu1 %v907_v2  ;;  %s216_s8 = scalar_lea.vmem %s1036_s2, %s717_s20 }
  0x11   : > { %v913_v4 = vld [vmem:[%s995_s23] sm:$0xff]   ;;  %839 = vmatprep.subr.bf16.mxu0 %v908_v3  ;;  %868 = vmatprep.subr.bf16.mxu1 %v908_v3  ;;  %v915_v10 = vld [vmem:[%s995_s23 + $0x8] sm:$0xff]   ;;  %v917_v12 = vld [vmem:[%s995_s23 + $0x10] sm:$0xff]  }
  0x12   : > { %v914_v5 = vld [vmem:[%s995_s23 + $0x20] sm:$0xff]   ;;  %849 = vmatprep.mubr.bf16.mxu0 %v913_v4  ;;  %v916_v11 = vld [vmem:[%s995_s23 + $0x28] sm:$0xff]   ;;  %v918_v13 = vld [vmem:[%s995_s23 + $0x30] sm:$0xff]  }
  0x13   : > { %857 = vmatprep.mubr.bf16.mxu1 %v914_v5  ;;  %v919_v14 = vld [vmem:[%s995_s23 + $0x18] sm:$0xff]  }
  0x14   : > { %840 = vmatpush3.bf16.msra.mxu0 %v908_v3  ;;  %876 = vmatpush3.bf16.msra.mxu1 %v908_v3  ;;  %v920_v15 = vld [vmem:[%s995_s23 + $0x38] sm:$0xff]  }
  0x15   : > { %841 = vmatprep.subr.bf16.mxu0 %v909_v6  ;;  %869 = vmatprep.subr.bf16.mxu1 %v909_v6 }
  0x18   : > { %842 = vmatpush3.bf16.msra.mxu0 %v909_v6  ;;  %877 = vmatpush3.bf16.msra.mxu1 %v909_v6 }
  0x19   : > { %843 = vmatprep.subr.bf16.mxu0 %v910_v7  ;;  %870 = vmatprep.subr.bf16.mxu1 %v910_v7 }
  0x1c   : > { %844 = vmatpush3.bf16.msra.mxu0 %v910_v7  ;;  %878 = vmatpush3.bf16.msra.mxu1 %v910_v7 }
  0x1d   : > { %845 = vmatprep.subr.bf16.mxu0 %v911_v8  ;;  %871 = vmatprep.subr.bf16.mxu1 %v911_v8 }
  0x20   : > { %846 = vmatpush3.bf16.msra.mxu0 %v911_v8  ;;  %879 = vmatpush3.bf16.msra.mxu1 %v911_v8 }
  0x21   : > { %847 = vmatprep.subr.bf16.mxu0 %v912_v9  ;;  %872 = vmatprep.subr.bf16.mxu1 %v912_v9 }
  0x24   : > { %848 = vmatpush3.bf16.msra.mxu0 %v912_v9  ;;  %880 = vmatpush3.bf16.msra.mxu1 %v912_v9 }
  0x27   : > { %850 = vmatmul.mubr.bf16.vlgmr.msra.gmra.mrb[0].mxu0 %v915_v10  ;;  %858 = vmatmul.mubr.bf16.vlgmr.msra.gmra.mrb[0].mxu1 %v916_v11 }
  0x28   : > { %853 = vmatprep.mubr.bf16.mxu0 %v917_v12  ;;  %861 = vmatprep.mubr.bf16.mxu1 %v918_v13 }
  0x2f   : > { %854 = vmatmul.mubr.bf16.gmra.mrb[4].mxu0 %v919_v14  ;;  %862 = vmatmul.mubr.bf16.gmra.mrb[4].mxu1 %v920_v15 }
  0xfa   : > { %v851_v16 = vpop.f32.mrb[0].mxu0  ;;  %v859_v17 = vpop.f32.mrb[0].mxu1 }
  0xfb   : > { %v417_v18 = vpop.f32.mrb[1].mxu0  ;;  %v449_v19 = vpop.f32.mrb[1].mxu1 }
  0xfc   : > { %v852_v20 = vpop.f32.mrb[2].mxu0  ;;  %v860_v21 = vpop.f32.mrb[2].mxu1 }
  0xfd   : > { %v778_v22 = vpack.c.bf16 %v852_v20, %v851_v16  ;;  %v798_v23 = vpack.c.bf16 %v860_v21, %v859_v17  ;;  %v420_v24 = vpop.f32.mrb[3].mxu0  ;;  %v452_v25 = vpop.f32.mrb[3].mxu1 }
  0xfe   : > { %v773_v26 = vpack.c.bf16 %v420_v24, %v417_v18  ;;  %v793_v27 = vpack.c.bf16 %v452_v25, %v449_v19 }
  0xff   : > { %810 = vst [vmem:[%s216_s8 + $0x8] sm:$0xff] %v778_v22   ;;  %814 = vst [vmem:[%s216_s8 + $0x28] sm:$0xff] %v798_v23  }
 0x100   : > { %774 = vst [vmem:[%s216_s8] sm:$0xff] %v773_v26   ;;  %813 = vst [vmem:[%s216_s8 + $0x20] sm:$0xff] %v793_v27  }
 0x102   : > { %v855_v28 = vpop.f32.mrb[4].mxu0  ;;  %v863_v29 = vpop.f32.mrb[4].mxu1 }
 0x103   : > { %v433_v30 = vpop.f32.mrb[5].mxu0  ;;  %v465_v31 = vpop.f32.mrb[5].mxu1 }
 0x104   : > { %v856_v32 = vpop.f32.mrb[6].mxu0  ;;  %v864_v33 = vpop.f32.mrb[6].mxu1 }
 0x105   : > { %v788_v34 = vpack.c.bf16 %v856_v32, %v855_v28  ;;  %v808_v35 = vpack.c.bf16 %v864_v33, %v863_v29  ;;  %v436_v36 = vpop.f32.mrb[7].mxu0  ;;  %v468_v37 = vpop.f32.mrb[7].mxu1 }
 0x106   : > { %v783_v38 = vpack.c.bf16 %v436_v36, %v433_v30  ;;  %v803_v39 = vpack.c.bf16 %v468_v37, %v465_v31 }
 0x107   : > { %812 = vst [vmem:[%s216_s8 + $0x18] sm:$0xff] %v788_v34   ;;  %816 = vst [vmem:[%s216_s8 + $0x38] sm:$0xff] %v808_v35  }
 0x108   : > { %811 = vst [vmem:[%s216_s8 + $0x10] sm:$0xff] %v783_v38   ;;  %815 = vst [vmem:[%s216_s8 + $0x30] sm:$0xff] %v803_v39  }
 0x109 PF: > { %s12_s11 = sadd.s32 1, %s943_s11   ;;  %s1037_s9 = smov %s939_s10 }
 0x10a   : > { %p9_p5 = scmp.ge.s32.totalorder %s12_s11, 4   ;;  %s1038_s10 = smov %s1040_s12 }
 0x10c   :  { %11 = sbr.rel (!%p9_p5) target bundleno = 2 (0x2), region = 69 }

// kernel: _graph_convolution_impl.3
= control target key start
LH: loop header
LB: loop body
LE: loop exit
PB: predicated region body
PF: predicated region fallthrough
CT: control target
= control target key end

     0   :  { %s1186_s0 = inlined_call_operand.vmem [shape: s32[2], index: 0, kind: input, shape index: {}]   ;;  %s1187_s2 = inlined_call_operand.vmem [shape: f32[256,256], index: 2, kind: input, shape index: {}]   ;;  %s1188_s3 = inlined_call_operand.vmem [shape: bf16[256,128], index: 3, kind: input, shape index: {}]   ;;  %s1189_s4 = inlined_call_operand.vmem [shape: f32[256,128], index: 4, kind: output, shape index: {}]   ;;  %s1190_s1 = inlined_call_operand.vmem [shape: s32[2,1], index: 1, kind: input, shape index: {}]  }
   0x1   :  { %s9_s17 = sshll.u32 %s1186_s0, 4  ;;  %s13_s20 = sshll.u32 %s1190_s1, 4  ;;  %s10_s17 = int_to_ptr.vmem [resolvable:$true] %s9_s17  ;;  %s14_s20 = int_to_ptr.vmem [resolvable:$true] %s13_s20 }
   0x2   :  { %s958_s21 = scalar_lea.vmem %s10_s17, 16  ;;  %p963_p1 = scmp.lt.s32.totalorder %s10_s17, %s10_s17 }
   0x3   :  { %p959_p0 = scmp.ne.s32.totalorder %s10_s17, %s958_s21  ;;  %p964_p2 = scmp.lt.s32.totalorder %s958_s21, %s958_s21 }
   0x5   :  { %p965_p3 = por %p964_p2, %p963_p1 }
   0x7   :  { %p966_p4 = pnand %p965_p3, %p959_p0 }
   0x9   :  { %969 = shalt.err (!%p966_p4)  }
   0xa   :  { %s1008_s22 = smov [#allocation3]   ;;  %s970_s23 = scalar_lea.vmem %s14_s20, 32 }
   0xb   :  { %12 = dma.vmem_to_smem %s10_s17, 16, %s1008_s22, [#allocation2] }
   0xc   :  { %p971_p5 = scmp.ne.s32.totalorder %s14_s20, %s970_s23  ;;  %p975_p6 = scmp.lt.s32.totalorder %s14_s20, %s14_s20 }
   0xd   :  { %p976_p7 = scmp.lt.s32.totalorder %s970_s23, %s970_s23 }
   0xf   :  { %p977_p8 = por %p976_p7, %p975_p6 }
  0x11   :  { %p978_p9 = pnand %p977_p8, %p971_p5 }
  0x13   :  { %981 = shalt.err (!%p978_p9)  }
  0x14   :  { %s1009_s0 = smov [#allocation4]  }
  0x15   :  { %16 = dma.vmem_to_smem %s14_s20, 32, %s1009_s0, [#allocation2] }
  0x16   :  { %994 = dma.done.wait [#allocation2], 48 }
  0x17   :  { %995 = vsyncadd [#allocation2], 4294967248 }
  0x18   :  { %18 = sfence }
  0x19   :  { %s1042_s1 = smov 0   ;;  %s1044_s24 = smov 0  }
  0x1a   :  { %s1046_s25 = smov 0  }
  0x1b LB: > { %s43_s26 = sadd.s32 1, %s1002_s24  ;;  %p804_p10 = scmp.ge.s32.totalorder %s1006_s25, 1  ;;  %s1006_s25 = sphi %s1046_s25, %s24_s25   ;;  %s1002_s24 = sphi %s1044_s24, %s1192_s24   ;;  %s998_s1 = sphi %s1042_s1, %s1191_s1  }
  0x1c   : > { %p45_p11 = scmp.ge.s32.totalorder %s43_s26, 2  ;;  %p234_p12 = scmp.lt.s32.totalorder %s1006_s25, 3 }
  0x1e   : > { %s1194_s26 = smov (%p45_p11, %s43_s26), 0  ;;  %p235_p13 = pnand %p804_p10, %p234_p12 }
  0x1f   : > { %s805_s27 = sshll.u32 (!%p235_p13), %s998_s1, 7  ;;  %s806_s28 = sshll.u32 (!%p235_p13), %s998_s1, 4  ;;  %v1010_v0 = vmov (!%p235_p13), 0.0  }
  0x20   : > { %238 = sbr.rel (%p235_p13) target bundleno = 324 (0x144), region = 28  ;;  %s1060_s29 = sld [smem:[#allocation4 + %s805_s27]] (!%p235_p13) }
  0x21   : > { %p298_p0 = scmp.lt.s32.totalorder (!%p235_p13), %s806_s28, 31  ;;  %s323_s30 = sld [smem:[#allocation4 + %s805_s27]] (!%p235_p13) }
  0x22   : > { %s1062_s5 = sld [smem:[#allocation3 + %s998_s1]] (!%p235_p13) }
  0x26   : > { %s807_s10 = sshll.u32 (!%p235_p13), %s1060_s29, 1 }
  0x27   : > { %s1196_s28 = smov (!%p298_p0, %s806_s28), 31  ;;  %p300_p1 = scmp.lt.s32.totalorder %s807_s10, 1 }
  0x28   : > { %s814_s6 = sshll.u32 %s1196_s28, 3  ;;  %s811_s11 = sshll.u32 %s323_s30, 5 }
  0x29   : > { %s1067_s9 = scalar_lea.vmem %s1189_s4, %s814_s6  ;;  %s808_s12 = sshll.u32 %s1196_s28, 1 }
  0x2a   : > { %355 = vst [vmem:[%s1067_s9] sm:$0xff] %v1010_v0  ;;  %356 = vst [vmem:[%s1067_s9 + $0x8] sm:$0xff] %v1010_v0  ;;  %p325_p2 = scmp.lt.s32.totalorder %s811_s11, 31  ;;  %s1198_s10 = smov (!%p300_p1, %s807_s10), 1 }
  0x2b   : > { %357 = vst [vmem:[%s1067_s9 + $0x10] sm:$0xff] %v1010_v0  ;;  %358 = vst [vmem:[%s1067_s9 + $0x18] sm:$0xff] %v1010_v0  ;;  %s303_s13 = sadd.s32 %s808_s12, %s1198_s10  ;;  %p816_p3 = scmp.le.s32.totalorder %s1062_s5, 0 }
  0x2c   : > { %359 = vst [vmem:[%s1067_s9 + $0x20] sm:$0xff] %v1010_v0  ;;  %360 = vst [vmem:[%s1067_s9 + $0x28] sm:$0xff] %v1010_v0  ;;  %s1200_s11 = smov (!%p325_p2, %s811_s11), 31  ;;  %s809_s14 = sshll.u32 %s303_s13, 3 }
  0x2d   : > { %361 = vst [vmem:[%s1067_s9 + $0x30] sm:$0xff] %v1010_v0  ;;  %362 = vst [vmem:[%s1067_s9 + $0x38] sm:$0xff] %v1010_v0  ;;  %s812_s15 = sshll.u32 %s1200_s11, 2  ;;  %s1089_s18 = scalar_lea.vmem %s1187_s2, %s809_s14 }
  0x2e   : > { %363 = vst [vmem:[%s1067_s9 + $0x40] sm:$0xff] %v1010_v0  ;;  %364 = vst [vmem:[%s1067_s9 + $0x48] sm:$0xff] %v1010_v0  ;;  %s1094_s21 = scalar_lea.vmem %s1188_s3, %s812_s15  ;;  %375 = sbr.rel (%p816_p3) target bundleno = 324 (0x144), region = 36  ;;  %v393_v12 = vld [vmem:[%s1089_s18 + $0x8] sm:$0xff] (!%p816_p3)  ;;  %v395_v13 = vld [vmem:[%s1089_s18 + $0x18] sm:$0xff] (!%p816_p3) }
  0x2f   : > { %365 = vst [vmem:[%s1067_s9 + $0x50] sm:$0xff] %v1010_v0  ;;  %366 = vst [vmem:[%s1067_s9 + $0x58] sm:$0xff] %v1010_v0  ;;  %v942_v1 = vld [vmem:[%s1094_s21 + $0x40] sm:$0xff] (!%p816_p3)   ;;  %v944_v3 = vld [vmem:[%s1094_s21 + $0x48] sm:$0xff] (!%p816_p3)   ;;  %v425_v15 = vpack.c.bf16 (!%p816_p3), %v395_v13, %v393_v12 }
  0x30   : > { %367 = vst [vmem:[%s1067_s9 + $0x60] sm:$0xff] %v1010_v0  ;;  %368 = vst [vmem:[%s1067_s9 + $0x68] sm:$0xff] %v1010_v0  ;;  %v943_v2 = vld [vmem:[%s1094_s21] sm:$0xff] (!%p816_p3)   ;;  %835 = vmatprep.subr.bf16.mxu0 (!%p816_p3), %v942_v1  ;;  %899 = vmatprep.subr.bf16.mxu1 (!%p816_p3), %v942_v1  ;;  %v945_v4 = vld [vmem:[%s1094_s21 + $0x8] sm:$0xff] (!%p816_p3)  }
  0x31   : > { %369 = vst [vmem:[%s1067_s9 + $0x70] sm:$0xff] %v1010_v0  ;;  %370 = vst [vmem:[%s1067_s9 + $0x78] sm:$0xff] %v1010_v0  ;;  %836 = vmatpush3.bf16.msra.mxu0 (!%p816_p3), %v943_v2  ;;  %907 = vmatpush3.bf16.msra.mxu1 (!%p816_p3), %v943_v2  ;;  %v946_v5 = vld [vmem:[%s1094_s21 + $0x50] sm:$0xff] (!%p816_p3)   ;;  %v948_v7 = vld [vmem:[%s1094_s21 + $0x58] sm:$0xff] (!%p816_p3)  }
  0x32   : > { %837 = vmatprep.subr.bf16.mxu0 (!%p816_p3), %v944_v3  ;;  %900 = vmatprep.subr.bf16.mxu1 (!%p816_p3), %v944_v3  ;;  %v947_v6 = vld [vmem:[%s1094_s21 + $0x10] sm:$0xff] (!%p816_p3)   ;;  %v949_v8 = vld [vmem:[%s1094_s21 + $0x18] sm:$0xff] (!%p816_p3)   ;;  %v950_v9 = vld [vmem:[%s1094_s21 + $0x60] sm:$0xff] (!%p816_p3)  }
  0x33   : > { %v951_v10 = vld [vmem:[%s1094_s21 + $0x20] sm:$0xff] (!%p816_p3)   ;;  %v952_v11 = vld [vmem:[%s1094_s21 + $0x68] sm:$0xff] (!%p816_p3)   ;;  %v411_v16 = vld [vmem:[%s1089_s18 + $0x98] sm:$0xff] (!%p816_p3)  ;;  %600 = vmatprep.mubr.bf16.mxu0 (!%p816_p3), %v425_v15 }
  0x34   : > { %v409_v14 = vld [vmem:[%s1089_s18 + $0x88] sm:$0xff] (!%p816_p3)  ;;  %v954_v19 = vld [vmem:[%s1094_s21 + $0x70] sm:$0xff] (!%p816_p3)   ;;  %v956_v21 = vld [vmem:[%s1094_s21 + $0x78] sm:$0xff] (!%p816_p3)  }
  0x35   : > { %838 = vmatpush3.bf16.msra.mxu0 %v945_v4  ;;  %908 = vmatpush3.bf16.msra.mxu1 %v945_v4  ;;  %v433_v17 = vpack.c.bf16 %v411_v16, %v409_v14  ;;  %v953_v18 = vld [vmem:[%s1094_s21 + $0x28] sm:$0xff]   ;;  %v955_v20 = vld [vmem:[%s1094_s21 + $0x30] sm:$0xff]   ;;  %v957_v22 = vld [vmem:[%s1094_s21 + $0x38] sm:$0xff]  }
  0x36   : > { %839 = vmatprep.subr.bf16.mxu0 %v946_v5  ;;  %901 = vmatprep.subr.bf16.mxu1 %v946_v5  ;;  %v392_v23 = vld [vmem:[%s1089_s18] sm:$0xff]  ;;  %v394_v24 = vld [vmem:[%s1089_s18 + $0x10] sm:$0xff]  ;;  %v397_v27 = vld [vmem:[%s1089_s18 + $0x28] sm:$0xff] }
  0x37   : > { %632 = vmatprep.mubr.bf16.mxu1 %v433_v17  ;;  %v408_v25 = vld [vmem:[%s1089_s18 + $0x80] sm:$0xff]  ;;  %v410_v26 = vld [vmem:[%s1089_s18 + $0x90] sm:$0xff]  ;;  %v399_v28 = vld [vmem:[%s1089_s18 + $0x38] sm:$0xff]  ;;  %v424_v31 = vpack.c.bf16 %v394_v24, %v392_v23 }
  0x38   : > { %v413_v29 = vld [vmem:[%s1089_s18 + $0xa8] sm:$0xff]  ;;  %v415_v30 = vld [vmem:[%s1089_s18 + $0xb8] sm:$0xff]  ;;  %v432_v32 = vpack.c.bf16 %v410_v26, %v408_v25  ;;  %v427_v33 = vpack.c.bf16 %v399_v28, %v397_v27  ;;  %v396_v35 = vld [vmem:[%s1089_s18 + $0x20] sm:$0xff] }
  0x39   : > { %840 = vmatpush3.bf16.msra.mxu0 %v947_v6  ;;  %909 = vmatpush3.bf16.msra.mxu1 %v947_v6  ;;  %v435_v34 = vpack.c.bf16 %v415_v30, %v413_v29  ;;  %v398_v36 = vld [vmem:[%s1089_s18 + $0x30] sm:$0xff]  ;;  %v412_v37 = vld [vmem:[%s1089_s18 + $0xa0] sm:$0xff]  ;;  %v401_v39 = vld [vmem:[%s1089_s18 + $0x48] sm:$0xff] }
  0x3a   : > { %841 = vmatprep.subr.bf16.mxu0 %v948_v7  ;;  %902 = vmatprep.subr.bf16.mxu1 %v948_v7  ;;  %v414_v38 = vld [vmem:[%s1089_s18 + $0xb0] sm:$0xff]  ;;  %v403_v40 = vld [vmem:[%s1089_s18 + $0x58] sm:$0xff]  ;;  %v417_v41 = vld [vmem:[%s1089_s18 + $0xc8] sm:$0xff]  ;;  %v426_v43 = vpack.c.bf16 %v398_v36, %v396_v35 }
  0x3b   : > { %v419_v42 = vld [vmem:[%s1089_s18 + $0xd8] sm:$0xff]  ;;  %v434_v44 = vpack.c.bf16 %v414_v38, %v412_v37  ;;  %v429_v45 = vpack.c.bf16 %v403_v40, %v401_v39  ;;  %v400_v47 = vld [vmem:[%s1089_s18 + $0x40] sm:$0xff]  ;;  %v402_v48 = vld [vmem:[%s1089_s18 + $0x50] sm:$0xff] }
  0x3c   : > { %v437_v46 = vpack.c.bf16 %v419_v42, %v417_v41  ;;  %v416_v49 = vld [vmem:[%s1089_s18 + $0xc0] sm:$0xff]  ;;  %v418_v50 = vld [vmem:[%s1089_s18 + $0xd0] sm:$0xff]  ;;  %v405_v51 = vld [vmem:[%s1089_s18 + $0x68] sm:$0xff]  ;;  %v428_v55 = vpack.c.bf16 %v402_v48, %v400_v47 }
  0x3d   : > { %842 = vmatpush3.bf16.msra.mxu0 %v949_v8  ;;  %910 = vmatpush3.bf16.msra.mxu1 %v949_v8  ;;  %v407_v52 = vld [vmem:[%s1089_s18 + $0x78] sm:$0xff]  ;;  %v421_v53 = vld [vmem:[%s1089_s18 + $0xe8] sm:$0xff]  ;;  %v436_v56 = vpack.c.bf16 %v418_v50, %v416_v49  ;;  %v404_v59 = vld [vmem:[%s1089_s18 + $0x60] sm:$0xff] }
  0x3e   : > { %843 = vmatprep.subr.bf16.mxu0 %v950_v9  ;;  %903 = vmatprep.subr.bf16.mxu1 %v950_v9  ;;  %v423_v54 = vld [vmem:[%s1089_s18 + $0xf8] sm:$0xff]  ;;  %v431_v57 = vpack.c.bf16 %v407_v52, %v405_v51  ;;  %v406_v60 = vld [vmem:[%s1089_s18 + $0x70] sm:$0xff]  ;;  %v420_v61 = vld [vmem:[%s1089_s18 + $0xe0] sm:$0xff] }
  0x3f   : > { %v439_v58 = vpack.c.bf16 %v423_v54, %v421_v53  ;;  %v422_v62 = vld [vmem:[%s1089_s18 + $0xf0] sm:$0xff]  ;;  %v430_v63 = vpack.c.bf16 %v406_v60, %v404_v59  ;;  %v376_v3 = vld [vmem:[%s1067_s9] sm:$0xff]  ;;  %v385_v13 = vld [vmem:[%s1067_s9 + $0x48] sm:$0xff] }
  0x40   : > { %v438_v0 = vpack.c.bf16 %v422_v62, %v420_v61  ;;  %v384_v5 = vld [vmem:[%s1067_s9 + $0x40] sm:$0xff]  ;;  %v378_v23 = vld [vmem:[%s1067_s9 + $0x10] sm:$0xff]  ;;  %v381_v51 = vld [vmem:[%s1067_s9 + $0x28] sm:$0xff] }
  0x41   : > { %844 = vmatpush3.bf16.msra.mxu0 %v951_v10  ;;  %911 = vmatpush3.bf16.msra.mxu1 %v951_v10  ;;  %v386_v25 = vld [vmem:[%s1067_s9 + $0x50] sm:$0xff]  ;;  %v389_v53 = vld [vmem:[%s1067_s9 + $0x68] sm:$0xff] }
  0x42   : > { %845 = vmatprep.subr.bf16.mxu0 %v952_v11  ;;  %904 = vmatprep.subr.bf16.mxu1 %v952_v11  ;;  %v377_v11 = vld [vmem:[%s1067_s9 + $0x8] sm:$0xff] }
  0x45   : > { %846 = vmatpush3.bf16.msra.mxu0 %v953_v18  ;;  %912 = vmatpush3.bf16.msra.mxu1 %v953_v18 }
  0x46   : > { %847 = vmatprep.subr.bf16.mxu0 %v954_v19  ;;  %905 = vmatprep.subr.bf16.mxu1 %v954_v19 }
  0x49   : > { %848 = vmatpush3.bf16.msra.mxu0 %v955_v20  ;;  %913 = vmatpush3.bf16.msra.mxu1 %v955_v20 }
  0x4a   : > { %849 = vmatprep.subr.bf16.mxu0 %v956_v21  ;;  %906 = vmatprep.subr.bf16.mxu1 %v956_v21 }
  0x4d   : > { %850 = vmatpush3.bf16.msra.mxu0 %v957_v22  ;;  %914 = vmatpush3.bf16.msra.mxu1 %v957_v22 }
  0x50   : > { %601 = vmatmul.mubr.bf16.vlgmr.msra.gmra.mrb[0].mxu0 %v424_v31  ;;  %633 = vmatmul.mubr.bf16.vlgmr.msra.gmra.mrb[0].mxu1 %v432_v32  ;;  %v379_v31 = vld [vmem:[%s1067_s9 + $0x18] sm:$0xff] }
  0x51   : > { %608 = vmatprep.mubr.bf16.mxu0 %v427_v33  ;;  %640 = vmatprep.mubr.bf16.mxu1 %v435_v34  ;;  %v387_v33 = vld [vmem:[%s1067_s9 + $0x58] sm:$0xff] }
  0x58   : > { %609 = vmatmul.mubr.bf16.gmra.mrb[4].mxu0 %v426_v43  ;;  %641 = vmatmul.mubr.bf16.gmra.mrb[4].mxu1 %v434_v44  ;;  %v380_v43 = vld [vmem:[%s1067_s9 + $0x20] sm:$0xff] }
  0x59   : > { %616 = vmatprep.mubr.bf16.mxu0 %v429_v45  ;;  %648 = vmatprep.mubr.bf16.mxu1 %v437_v46  ;;  %v388_v45 = vld [vmem:[%s1067_s9 + $0x60] sm:$0xff] }
  0x60   : > { %617 = vmatmul.mubr.bf16.gmra.mrb[8].mxu0 %v428_v55  ;;  %649 = vmatmul.mubr.bf16.gmra.mrb[8].mxu1 %v436_v56 }
  0x61   : > { %624 = vmatprep.mubr.bf16.mxu0 %v431_v57  ;;  %656 = vmatprep.mubr.bf16.mxu1 %v439_v58 }
  0x68   : > { %625 = vmatmul.mubr.bf16.gmra.mrb[12].mxu0 %v430_v63  ;;  %657 = vmatmul.mubr.bf16.gmra.mrb[12].mxu1 %v438_v0  ;;  %v382_v63 = vld [vmem:[%s1067_s9 + $0x30] sm:$0xff] }
 0x123   : > { %v851_v1 = vpop.f32.mrb[0].mxu0  ;;  %v875_v2 = vpop.f32.mrb[0].mxu1 }
 0x124   : > { %v852_v4 = vpop.f32.mrb[1].mxu0  ;;  %v876_v6 = vpop.f32.mrb[1].mxu1 }
 0x125   : > { %v853_v7 = vadd.f32 %v852_v4, %v851_v1  ;;  %v877_v8 = vadd.f32 %v876_v6, %v875_v2  ;;  %v854_v9 = vpop.f32.mrb[2].mxu0  ;;  %v878_v10 = vpop.f32.mrb[2].mxu1  ;;  %v390_v1 = vld [vmem:[%s1067_s9 + $0x70] sm:$0xff] }
 0x126   : > { %v855_v12 = vpop.f32.mrb[3].mxu0  ;;  %v879_v14 = vpop.f32.mrb[3].mxu1 }
 0x127   : > { %v665_v15 = vadd.f32 %v853_v7, %v376_v3  ;;  %v673_v16 = vadd.f32 %v877_v8, %v384_v5  ;;  %v856_v17 = vadd.f32 %v855_v12, %v854_v9  ;;  %v880_v18 = vadd.f32 %v879_v14, %v878_v10  ;;  %v383_v7 = vld [vmem:[%s1067_s9 + $0x38] sm:$0xff] }
 0x128   : > { %v391_v9 = vld [vmem:[%s1067_s9 + $0x78] sm:$0xff] }
 0x129   : > { %681 = vst [vmem:[%s1067_s9] sm:$0xff] %v665_v15  ;;  %689 = vst [vmem:[%s1067_s9 + $0x40] sm:$0xff] %v673_v16  ;;  %v666_v19 = vadd.f32 %v856_v17, %v377_v11  ;;  %v674_v20 = vadd.f32 %v880_v18, %v385_v13 }
 0x12b   : > { %682 = vst [vmem:[%s1067_s9 + $0x8] sm:$0xff] %v666_v19  ;;  %690 = vst [vmem:[%s1067_s9 + $0x48] sm:$0xff] %v674_v20  ;;  %v857_v21 = vpop.f32.mrb[4].mxu0  ;;  %v881_v22 = vpop.f32.mrb[4].mxu1 }
 0x12c   : > { %v858_v24 = vpop.f32.mrb[5].mxu0  ;;  %v882_v26 = vpop.f32.mrb[5].mxu1 }
 0x12d   : > { %v859_v27 = vadd.f32 %v858_v24, %v857_v21  ;;  %v883_v28 = vadd.f32 %v882_v26, %v881_v22  ;;  %v860_v29 = vpop.f32.mrb[6].mxu0  ;;  %v884_v30 = vpop.f32.mrb[6].mxu1 }
 0x12e   : > { %v861_v32 = vpop.f32.mrb[7].mxu0  ;;  %v885_v34 = vpop.f32.mrb[7].mxu1 }
 0x12f   : > { %v667_v35 = vadd.f32 %v859_v27, %v378_v23  ;;  %v675_v36 = vadd.f32 %v883_v28, %v386_v25  ;;  %v862_v37 = vadd.f32 %v861_v32, %v860_v29  ;;  %v886_v38 = vadd.f32 %v885_v34, %v884_v30 }
 0x131   : > { %683 = vst [vmem:[%s1067_s9 + $0x10] sm:$0xff] %v667_v35  ;;  %691 = vst [vmem:[%s1067_s9 + $0x50] sm:$0xff] %v675_v36  ;;  %v668_v39 = vadd.f32 %v862_v37, %v379_v31  ;;  %v676_v40 = vadd.f32 %v886_v38, %v387_v33 }
 0x133   : > { %684 = vst [vmem:[%s1067_s9 + $0x18] sm:$0xff] %v668_v39  ;;  %692 = vst [vmem:[%s1067_s9 + $0x58] sm:$0xff] %v676_v40  ;;  %v863_v41 = vpop.f32.mrb[8].mxu0  ;;  %v887_v42 = vpop.f32.mrb[8].mxu1 }
 0x134   : > { %v864_v44 = vpop.f32.mrb[9].mxu0  ;;  %v888_v46 = vpop.f32.mrb[9].mxu1 }
 0x135   : > { %v865_v47 = vadd.f32 %v864_v44, %v863_v41  ;;  %v889_v48 = vadd.f32 %v888_v46, %v887_v42  ;;  %v866_v49 = vpop.f32.mrb[10].mxu0  ;;  %v890_v50 = vpop.f32.mrb[10].mxu1 }
 0x136   : > { %v867_v52 = vpop.f32.mrb[11].mxu0  ;;  %v891_v54 = vpop.f32.mrb[11].mxu1 }
 0x137   : > { %v669_v55 = vadd.f32 %v865_v47, %v380_v43  ;;  %v677_v56 = vadd.f32 %v889_v48, %v388_v45  ;;  %v868_v57 = vadd.f32 %v867_v52, %v866_v49  ;;  %v892_v58 = vadd.f32 %v891_v54, %v890_v50 }
 0x139   : > { %685 = vst [vmem:[%s1067_s9 + $0x20] sm:$0xff] %v669_v55  ;;  %693 = vst [vmem:[%s1067_s9 + $0x60] sm:$0xff] %v677_v56  ;;  %v670_v59 = vadd.f32 %v868_v57, %v381_v51  ;;  %v678_v60 = vadd.f32 %v892_v58, %v389_v53 }
 0x13b   : > { %686 = vst [vmem:[%s1067_s9 + $0x28] sm:$0xff] %v670_v59  ;;  %694 = vst [vmem:[%s1067_s9 + $0x68] sm:$0xff] %v678_v60  ;;  %v869_v61 = vpop.f32.mrb[12].mxu0  ;;  %v893_v62 = vpop.f32.mrb[12].mxu1 }
 0x13c   : > { %v870_v0 = vpop.f32.mrb[13].mxu0  ;;  %v894_v2 = vpop.f32.mrb[13].mxu1 }
 0x13d   : > { %v871_v3 = vadd.f32 %v870_v0, %v869_v61  ;;  %v895_v4 = vadd.f32 %v894_v2, %v893_v62  ;;  %v872_v5 = vpop.f32.mrb[14].mxu0  ;;  %v896_v6 = vpop.f32.mrb[14].mxu1 }
 0x13e   : > { %v873_v8 = vpop.f32.mrb[15].mxu0  ;;  %v897_v10 = vpop.f32.mrb[15].mxu1 }
 0x13f   : > { %v671_v11 = vadd.f32 %v871_v3, %v382_v63  ;;  %v679_v12 = vadd.f32 %v895_v4, %v390_v1  ;;  %v874_v13 = vadd.f32 %v873_v8, %v872_v5  ;;  %v898_v14 = vadd.f32 %v897_v10, %v896_v6 }
 0x141   : > { %687 = vst [vmem:[%s1067_s9 + $0x30] sm:$0xff] %v671_v11  ;;  %695 = vst [vmem:[%s1067_s9 + $0x70] sm:$0xff] %v679_v12  ;;  %v672_v15 = vadd.f32 %v874_v13, %v383_v7  ;;  %v680_v16 = vadd.f32 %v898_v14, %v391_v9 }
 0x143   : > { %688 = vst [vmem:[%s1067_s9 + $0x38] sm:$0xff] %v672_v15  ;;  %696 = vst [vmem:[%s1067_s9 + $0x78] sm:$0xff] %v680_v16 }
 0x144 PF: > { %s24_s25 = sadd.s32 1, %s1006_s25   ;;  %s1191_s1 = smov %s1002_s24 }
 0x145   : > { %p21_p4 = scmp.ge.s32.totalorder %s24_s25, 4   ;;  %s1192_s24 = smov %s1194_s26 }
 0x147   :  { %23 = sbr.rel (!%p21_p4) target bundleno = 27 (0x1b), region = 69 }

</bundles_post_ra>
